<compile_context>
chip_gen: v5e
topology: v5e:2x2
jax: 0.10.0
libtpu: 0.0.40
codegen_flags: <defaults>
</compile_context>

<pallas_src>
import jax
import jax.numpy as jnp
from jax.experimental import pallas as pl
from jax.experimental.pallas import tpu as pltpu


def _round_up(x, m):
    return (x + m - 1) // m * m


def _vmem_need_bytes(c, h_tile, w, p):
    """Approximate scoped-VMEM footprint for one pipeline configuration."""
    hp_t, wp = h_tile // p, w // p
    blk = 2 * c * h_tile * w * 4                                   # double-buffered input
    pr = 2 * _round_up(hp_t, 8) * _round_up(c * h_tile, 128) * 4   # Pr (maybe 2 bufs)
    pc = 2 * _round_up(w, 8) * _round_up(wp, 128) * 4               # Pc (maybe 2 bufs)
    out = 2 * 8 * 128 * 4                                           # output blocks
    tmp = c * h_tile * w * 4 + _round_up(hp_t, 8) * _round_up(w, 128) * 4  # temporaries
    return blk + pr + pc + out + tmp


def _choose_h_tile(h, p, c, w, budget_bytes):
    """Largest h-tile that divides h, is pooling/sublane aligned and whose
    full pipeline footprint (input x2 + Pr + Pc + outputs) fits the budget."""
    cands = [t for t in range(p, h + 1, p)
             if h % t == 0 and (t % 8 == 0 or t == h)]
    if not cands:
        cands = [h]
    fitting = [t for t in cands if _vmem_need_bytes(c, t, w, p) <= budget_bytes]
    # TODO(synk): add an optional W-tiling grid axis for 4K-class images where
    # even the smallest aligned h tile exceeds the budget (fallback below is
    # best-effort and only bounded by vmem_limit_bytes).
    return max(fitting) if fitting else min(cands)


def _make_l_exp_kernel(c, h_tile, w, p, mean_val):
    def kernel(x_ref, pr_ref, pc_ref, o_ref):
        # x_ref : (c, h_tile, w)      batch dim squeezed away by BlockSpec
        # pr_ref: (hp_t, c*h_tile)    channel-sum + row-pool matrix (entries 1)
        # pc_ref: (w, wp)             column-pool matrix, nonzeros = 1/(c*p*p)
        # o_ref : (1, 1, 8, 128)      this program's partial-sum tile

        # Zero-copy merge of (c, h_tile) -> c*h_tile (h_tile % 8 == 0, w = lanes).
        x2 = x_ref[...].reshape(c * h_tile, w)

        # Channel sum + row pooling on the MXU, then column pooling (with the
        # 1/(c*p*p) normalization folded into Pc):
        #   pooled == AvgPool2d(p)(mean_c(x)) for this tile.
        row_sum = jnp.dot(pr_ref[...], x2,
                          preferred_element_type=jnp.float32)       # (hp_t, w)
        pooled = jnp.dot(row_sum, pc_ref[...],
                         preferred_element_type=jnp.float32)        # (hp_t, wp)

        diff = pooled - jnp.float32(mean_val)
        sq_sum = jnp.sum(diff * diff)

        # Lane-dense, unmasked store of this program's partial sum.
        o_ref[...] = jnp.full((1, 1, 8, 128), sq_sum, dtype=jnp.float32)

    return kernel


def l_exp_pallas(x, patch_size, mean_val, *, vmem_budget_bytes=16 << 20):
    b, c, h, w = x.shape
    p = patch_size
    assert h % p == 0 and w % p == 0
    x = x.astype(jnp.float32)

    h_tile = _choose_h_tile(h, p, c, w, vmem_budget_bytes)
    grid_h = h // h_tile
    hp_t, hp, wp = h_tile // p, h // p, w // p

    # Precomputed (hoisted) pooling matrices.
    # Pr[r, ch*h_tile + row] = 1  iff  row // p == r   (channel sum + row pool)
    row_sel = ((jnp.arange(h_tile, dtype=jnp.int32) // p)[None, :]
               == jnp.arange(hp_t, dtype=jnp.int32)[:, None])
    pr = jnp.tile(row_sel.astype(jnp.float32), (1, c))               # (hp_t, c*h_tile)
    # Pc[col, j] = 1/(c*p*p)  iff  col // p == j        (column pool + normalize)
    col_sel = ((jnp.arange(w, dtype=jnp.int32) // p)[:, None]
               == jnp.arange(wp, dtype=jnp.int32)[None, :])
    pc = col_sel.astype(jnp.float32) * jnp.float32(1.0 / (c * p * p))  # (w, wp)

    # Scoped VMEM limit: actual footprint + headroom, floored at 32 MiB and
    # capped at v7x's 64 MiB physical VMEM (safe on v5e/v6e as well).
    vmem_limit = int(min(max(_vmem_need_bytes(c, h_tile, w, p) + (4 << 20),
                             32 << 20), 64 << 20))

    kernel = _make_l_exp_kernel(c, h_tile, w, p, mean_val)

    partials = pl.pallas_call(
        kernel,
        out_shape=jax.ShapeDtypeStruct((b, grid_h, 8, 128), jnp.float32),
        grid_spec=pltpu.PrefetchScalarGridSpec(
            num_scalar_prefetch=0,
            grid=(b, grid_h),
            in_specs=[
                # one (c, h_tile, w) image slab per grid step
                pl.BlockSpec((pl.Squeezed(), c, h_tile, w),
                             lambda i, j: (i, 0, j, 0)),
                # pooling matrices: constant index_map -> DMA'd once, resident
                pl.BlockSpec((hp_t, c * h_tile), lambda i, j: (0, 0)),
                pl.BlockSpec((w, wp), lambda i, j: (0, 0)),
            ],
            out_specs=pl.BlockSpec((1, 1, 8, 128), lambda i, j: (i, j, 0, 0)),
        ),
        compiler_params=pltpu.CompilerParams(
            dimension_semantics=("parallel", "parallel"),
            vmem_limit_bytes=vmem_limit,
        ),
    )(x, pr, pc)

    # Every lane of each (8,128) tile holds that program's partial sum, so a
    # full lane-dense sum + an extra /(8*128) avoids a strided gather in XLA.
    return jnp.sum(partials) / jnp.float32(b * hp * wp * 8 * 128)


def l_exp_reference(x, patch_size, mean_val):
    # Pure-JAX reference mirroring the PyTorch forward.
    b, c, h, w = x.shape
    xm = jnp.mean(x, axis=1, keepdims=True)  # (b,1,h,w)
    hp, wp = h // patch_size, w // patch_size
    pooled = xm.reshape(b, 1, hp, patch_size, wp, patch_size).mean(axis=(3, 5))
    return jnp.mean((pooled - jnp.float32(mean_val)) ** 2)


if __name__ == "__main__":
    key = jax.random.PRNGKey(0)
    b, c, h, w = 2, 4, 16, 16
    patch_size = 4
    mean_val = 0.6

    x = jax.random.uniform(key, (b, c, h, w), dtype=jnp.float32)

    d = l_exp_pallas(x, patch_size, mean_val)
    jax.block_until_ready(d)

    d_ref = l_exp_reference(x, patch_size, mean_val)
    assert jnp.allclose(d, d_ref, rtol=1e-5, atol=1e-6), (d, d_ref)

    print("KERNEL_OK")
</pallas_src>

<mosaic_0001>
module attributes {stable_mosaic.version = 11 : i64} {
  func.func @kernel(%arg0: i32, %arg1: i32, %arg2: memref<1x4x16x16xf32, #tpu.memory_space<vmem>>, %arg3: memref<4x64xf32, #tpu.memory_space<vmem>>, %arg4: memref<16x4xf32, #tpu.memory_space<vmem>>, %arg5: memref<1x1x8x128xf32, #tpu.memory_space<vmem>>) attributes {dimension_semantics = [#tpu.dimension_semantics<parallel>, #tpu.dimension_semantics<parallel>], iteration_bounds = array<i64: 2, 1>, scalar_prefetch = 0 : i64, scratch_operands = 0 : i64, tpu.core_type = #tpu.core_type<tc>, window_params = [{transform_indices = @transform_0, window_bounds = array<i64: 1, 4, 16, 16>}, {pipeline_mode = #tpu.pipeline_mode<synchronous>, transform_indices = @transform_1, window_bounds = array<i64: 4, 64>}, {pipeline_mode = #tpu.pipeline_mode<synchronous>, transform_indices = @transform_2, window_bounds = array<i64: 16, 4>}, {transform_indices = @transform_3, window_bounds = array<i64: 1, 1, 8, 128>}]} {
    %c0 = arith.constant 0 : index
    %c0_0 = arith.constant 0 : index
    %c0_1 = arith.constant 0 : index
    %c0_2 = arith.constant 0 : index
    %0 = vector.load %arg2[%c0, %c0_0, %c0_1, %c0_2] : memref<1x4x16x16xf32, #tpu.memory_space<vmem>>, vector<1x4x16x16xf32>
    %1 = vector.shape_cast %0 : vector<1x4x16x16xf32> to vector<4x16x16xf32>
    %2 = vector.shape_cast %1 : vector<4x16x16xf32> to vector<64x16xf32>
    %c0_3 = arith.constant 0 : index
    %c0_4 = arith.constant 0 : index
    %3 = vector.load %arg3[%c0_3, %c0_4] : memref<4x64xf32, #tpu.memory_space<vmem>>, vector<4x64xf32>
    %cst = arith.constant dense<0.000000e+00> : vector<4x16xf32>
    %4 = tpu.matmul %3, %2, %cst {dimension_numbers = #tpu.dot_dimension_numbers<[1], [0], [0], [1], [0, 0, 1, 1], [], []>} : vector<4x64xf32>, vector<64x16xf32>, vector<4x16xf32> -> vector<4x16xf32>
    %c0_5 = arith.constant 0 : index
    %c0_6 = arith.constant 0 : index
    %5 = vector.load %arg4[%c0_5, %c0_6] : memref<16x4xf32, #tpu.memory_space<vmem>>, vector<16x4xf32>
    %cst_7 = arith.constant dense<0.000000e+00> : vector<4x4xf32>
    %6 = tpu.matmul %4, %5, %cst_7 {dimension_numbers = #tpu.dot_dimension_numbers<[1], [0], [0], [1], [0, 0, 1, 1], [], []>} : vector<4x16xf32>, vector<16x4xf32>, vector<4x4xf32> -> vector<4x4xf32>
    %cst_8 = arith.constant 6.000000e-01 : f32
    %7 = vector.broadcast %cst_8 : f32 to vector<4x4xf32>
    %8 = arith.subf %6, %7 : vector<4x4xf32>
    %9 = arith.mulf %8, %8 : vector<4x4xf32>
    %10 = vector.shape_cast %9 : vector<4x4xf32> to vector<1x4x4xf32>
    %cst_9 = arith.constant dense<0.000000e+00> : vector<1xf32>
    %11 = vector.multi_reduction <add>, %10, %cst_9 [1, 2] : vector<1x4x4xf32> to vector<1xf32>
    %12 = vector.shape_cast %11 : vector<1xf32> to vector<1x1x1xf32>
    %13 = vector.extract %12[0, 0, 0] : f32 from vector<1x1x1xf32>
    %14 = vector.broadcast %13 : f32 to vector<1x1x8x128xf32>
    %c0_10 = arith.constant 0 : index
    %c0_11 = arith.constant 0 : index
    %c0_12 = arith.constant 0 : index
    %c0_13 = arith.constant 0 : index
    %15 = vector.load %arg5[%c0_10, %c0_11, %c0_12, %c0_13] : memref<1x1x8x128xf32, #tpu.memory_space<vmem>>, vector<1x1x8x128xf32>
    tpu.vector_store %arg5[%c0_10, %c0_11, %c0_12, %c0_13], %14 {strides = array<i32>} : memref<1x1x8x128xf32, #tpu.memory_space<vmem>>, vector<1x1x8x128xf32>,
    return
  }
  func.func @transform_0(%arg0: i32, %arg1: i32) -> (i32, i32, i32, i32) {
    %c0_i32 = arith.constant 0 : i32
    %c0_i32_0 = arith.constant 0 : i32
    %c0_i32_1 = arith.constant 0 : i32
    return %arg0, %c0_i32, %arg1, %c0_i32_0 : i32, i32, i32, i32
  }
  func.func @transform_1(%arg0: i32, %arg1: i32) -> (i32, i32) {
    %c0_i32 = arith.constant 0 : i32
    %c0_i32_0 = arith.constant 0 : i32
    %c0_i32_1 = arith.constant 0 : i32
    return %c0_i32, %c0_i32_0 : i32, i32
  }
  func.func @transform_2(%arg0: i32, %arg1: i32) -> (i32, i32) {
    %c0_i32 = arith.constant 0 : i32
    %c0_i32_0 = arith.constant 0 : i32
    %c0_i32_1 = arith.constant 0 : i32
    return %c0_i32, %c0_i32_0 : i32, i32
  }
  func.func @transform_3(%arg0: i32, %arg1: i32) -> (i32, i32, i32, i32) {
    %c0_i32 = arith.constant 0 : i32
    %c0_i32_0 = arith.constant 0 : i32
    %c0_i32_1 = arith.constant 0 : i32
    return %arg0, %arg1, %c0_i32, %c0_i32_0 : i32, i32, i32, i32
  }
}

</mosaic_0001>

<bundles_post_ra>
// kernel: tpu_custom_call.1
= control target key start
LH: loop header
LB: loop body
LE: loop exit
PB: predicated region body
PF: predicated region fallthrough
CT: control target
= control target key end

     0   :  { %8 = vsyncpa [#allocation3], 0  ;;  %s733_s0 = inlined_call_operand.hbm [shape: f32[2,4,16,16], index: 0, kind: input, shape index: {}]   ;;  %s734_s1 = inlined_call_operand.vmem [shape: f32[4,64], index: 1, kind: input, shape index: {}]   ;;  %s735_s2 = inlined_call_operand.vmem [shape: f32[16,4], index: 2, kind: input, shape index: {}]   ;;  %s736_s3 = inlined_call_operand.hbm [shape: f32[2,1,8,128], index: 3, kind: output, shape index: {}]  }
   0x1   :  { %10 = vsyncpa [#allocation3 + $0x1], 0 }
   0x2   :  { %11 = vsyncpa [#allocation4], 0 }
   0x3   :  { %13 = vsyncpa [#allocation4 + $0x1], 0  ;;  %s603_s12 = smov 0   ;;  %s605_s13 = smov 0  }
   0x4   :  { %s607_s14 = smov 0   ;;  %s609_s15 = smov 0  }
   0x5   :  { %s611_s16 = smov 0   ;;  %s613_s17 = smov 0  }
   0x6 LB: > { %s383_s18 = sadd.s32 4294967295, %s579_s17   ;;  %s384_s19 = sadd.s32 4294967294, %s579_s17   ;;  %s579_s17 = sphi %s613_s17, %s19_s17   ;;  %s575_s16 = sphi %s611_s16, %s745_s16   ;;  %s571_s15 = sphi %s609_s15, %s744_s15   ;;  %s567_s14 = sphi %s607_s14, %s743_s14   ;;  %s563_s13 = sphi %s605_s13, %s742_s13   ;;  %s559_s12 = sphi %s603_s12, %s741_s12  }
   0x7   : > { %s31_s20 = sadd.s32 1, %s575_s16  ;;  %s40_s21 = sadd.s32 1, %s567_s14 }
   0x8   : > { %p33_p0 = scmp.ge.s32.totalorder %s31_s20, 2  ;;  %p47_p1 = scmp.ne.s32.totalorder %s567_s14, %s563_s13 }
   0x9   : > { %p48_p2 = scmp.eq.s32.totalorder %s579_s17, 0  ;;  %p53_p3 = scmp.ne.s32.totalorder %s563_s13, %s559_s12 }
   0xa   : > { %s747_s20 = smov (%p33_p0, %s31_s20), 0  ;;  %p54_p5 = scmp.eq.s32.totalorder %s383_s18, 0 }
   0xb   : > { %p644_p4 = por %p48_p2, %p47_p1  ;;  %s35_s23 = ssub.s32 %s575_s16, %s747_s20 }
   0xc   : > { %p121_p6 = scmp.eq.s32.totalorder %s383_s18, 1  ;;  %p38_p7 = scmp.eq.s32.totalorder %s35_s23, 0 }
   0xd   : > { %p650_p8 = por %p54_p5, %p53_p3  ;;  %p127_p10 = scmp.eq.s32.totalorder %s384_s19, 1 }
   0xe   : > { %p654_p9 = por %p121_p6, %p47_p1  ;;  %p386_p12 = scmp.ge.s32.totalorder %s579_s17, 2 }
   0xf   : > { %s659_s26 = scalar_select %p38_p7, %s567_s14, %s40_s21  }
  0x10   : > { %p661_p11 = por %p127_p10, %p53_p3  ;;  %p415_p13 = scmp.lt.s32.totalorder %s579_s17, 2 }
  0x11   : > { %s153_s28 = sand.u32 1, %s567_s14   ;;  %s400_s30 = sshll.u32 %s575_s16, 6 }
  0x12   : > { %s387_s29 = sshll.u32 %s153_s28, 6  ;;  %s164_s6 = scalar_lea.hbm %s733_s0, %s400_s30 }
  0x13   : > { %s157_s7 = scalar_lea.vmem [#allocation2], %s387_s29  ;;  %s165_s9 = sshll.u32 %s164_s6, 4  ;;  %s166_s9 = int_to_ptr.hbm [resolvable:$true] %s165_s9 }
  0x14   : > { %s167_s8 = sshll.u32 %s157_s7, 4  ;;  %p408_p0 = pnand %p415_p13, %p644_p4  ;;  %s168_s8 = int_to_ptr.vmem [resolvable:$true] %s167_s8 }
  0x15   : > { %p390_p1 = scmp.ge.s32.totalorder %s579_s17, 1  ;;  %s154_s10 = scalar_lea.sflag [#allocation3], %s153_s28 }
  0x16   : > { %s581_s11 = smov 128   ;;  %s582_s18 = smov 8  }
  0x17   : > { %410 = dma.hbm_to_vmem [thread:$0]  (!%p408_p0), %s166_s9, 1024, %s168_s8, %s154_s10, %s581_s11, %s581_s11, %s582_s18  }
  0x18   : > { %p175_p2 = scmp.lt.s32.totalorder %s579_s17, 3 }
  0x1a   : > { %p176_p3 = pnand %p390_p1, %p175_p2 }
  0x1b   : > { %s677_s19 = sand.u32 (!%p176_p3), 1, %s563_s13  }
  0x1c   : > { %179 = sbr.rel (%p176_p3) target bundleno = 489 (0x1e9), region = 32  ;;  %s391_s21 = sshll.u32 (!%p176_p3), %s677_s19, 6 }
  0x1d   : > { %s182_s23 = scalar_lea.sflag (!%p176_p3), [#allocation3], %s677_s19  ;;  %s185_s29 = scalar_lea.vmem (!%p176_p3), [#allocation2], %s391_s21 }
  0x21   : > { %550 = dma.done.wait (%p650_p8), %s182_s23, 1024  }
  0x22   : > { %552 = vsyncadd (%p650_p8), %s182_s23, 4294966272  ;;  %v217_v0 = vld [vmem:[%s185_s29 + $0x38] sm:$0xff]  ;;  %v216_v1 = vld [vmem:[%s185_s29 + $0x30] sm:$0xff]  ;;  %vm219_vm0 = vcmask 523264   ;;  %vm245_vm1 = vcmask 130048   ;;  %vm271_vm2 = vcmask 27648  }
  0x23   : > { %231 = vmatpush.msra.mxu0 %v217_v0  ;;  %v215_v2 = vld [vmem:[%s185_s29 + $0x28] sm:$0xff]  ;;  %v214_v4 = vld [vmem:[%s185_s29 + $0x20] sm:$0xff]  ;;  %v213_v5 = vld [vmem:[%s185_s29 + $0x18] sm:$0xff]  ;;  %s392_s6 = sshll.u32 %s677_s19, 3  ;;  %s397_s7 = sshll.u32 %s571_s15, 3 }
  0x24   : > { %v244_v3 = vld [vmem:[%s735_s2 + $0x8] sm:$0xff]  ;;  %v212_v6 = vld [vmem:[%s185_s29 + $0x10] sm:$0xff]  ;;  %v210_v8 = vld [vmem:[%s185_s29] sm:$0xff]  ;;  %s296_s10 = scalar_lea.hbm %s736_s3, %s397_s7  ;;  %s208_s11 = scalar_lea.vmem [#allocation5], %s392_s6 }
  0x25   : > { %232 = vmatpush.msra.mxu0 %v216_v1  ;;  %263 = vmatpush.msra.mxu1 %v244_v3  ;;  %v211_v7 = vld [vmem:[%s185_s29 + $0x8] sm:$0xff]  ;;  %v218_v9 = vld [vmem:[%s734_s1] sm:$0xf]  ;;  %s298_s18 = sshll.u32 %s208_s11, 4  ;;  %s300_s21 = sshll.u32 %s296_s10, 4  ;;  %s299_s18 = int_to_ptr.vmem [resolvable:$true] %s298_s18  ;;  %s301_s21 = int_to_ptr.hbm [resolvable:$true] %s300_s21 }
  0x26   : > { %v243_v10 = vld [vmem:[%s735_s2] sm:$0xff]  ;;  %s285_s29 = scalar_lea.sflag [#allocation4], %s677_s19  ;;  %s511_s22 = sshra.s32 %s301_s21, 4  ;;  %s512_s22 = int_to_ptr.hbm [resolvable:$true] %s511_s22 }
  0x27   : > { %233 = vmatpush.msra.mxu0 %v215_v2  ;;  %264 = vmatpush.msra.mxu1 %v243_v10  ;;  %s513_s28 = scalar_lea.hbm %s512_s22, 8  ;;  %s517_s30 = scalar_lea.hbm %s736_s3, 16 }
  0x28   : > { %p514_p4 = scmp.ne.s32.totalorder %s512_s22, %s513_s28  ;;  %p518_p7 = scmp.lt.s32.totalorder %s512_s22, %s736_s3 }
  0x29   : > { %234 = vmatpush.msra.mxu0 %v214_v4  ;;  %p519_p8 = scmp.lt.s32.totalorder %s517_s30, %s513_s28 }
  0x2a   : > { %p515_p5 = pnand %p514_p4, %p654_p9 }
  0x2b   : > { %235 = vmatpush.msra.mxu0 %v213_v5  ;;  %p520_p10 = por %p519_p8, %p518_p7 }
  0x2c   : > { %p516_p6 = pneg %p515_p5 }
  0x2d   : > { %236 = vmatpush.msra.mxu0 %v212_v6 }
  0x2e   : > { %p521_p13 = pnand %p520_p10, %p516_p6 }
  0x2f   : > { %237 = vmatpush.msra.mxu0 %v211_v7 }
  0x31   : > { %238 = vmatpush.msra.mxu0 %v210_v8 }
  0x32   : > { %393 = vmatmul.msk.f32.vlgmr.msra.gmra.mxu0 %vm219_vm0, %v218_v9 }
  0xaf   : > { %v240_v11 = vpop.f32.mrf.mxu0 }
  0xb0   : > { %394 = vmatmul.msk.f32.vlgmr.msra.gmra.mxu1 %vm245_vm1, %v240_v11 }
 0x12d   : > { %v266_v12 = vpop.f32.mrf.mxu1 }
 0x12e   : > { %v395_v13 = vadd.f32 -0.6, %v266_v12 }
 0x130   : > { %v270_v14 = vmul.f32 %v395_v13, %v395_v13 }
 0x132   : > { %v272_v15 = vsel %vm271_vm2, %v270_v14, 0.0 }
 0x133   : > { %273 = vadd.xlane.f32.xlu0 %v272_v15 }
 0x1a6   : > { %v274_v16 = vpop.xlane.xlu0 %273 }
 0x1a7   : > { %v275_v17 = vrot.slane %v274_v16, 4 }
 0x1a9   : > { %v276_v18 = vadd.f32 %v275_v17, %v274_v16 }
 0x1ab   : > { %v277_v19 = vrot.slane %v276_v18, 2 }
 0x1ad   : > { %v278_v20 = vadd.f32 %v277_v19, %v276_v18 }
 0x1af   : > { %v279_v21 = vrot.slane %v278_v20, 1 }
 0x1b1   : > { %v280_v22 = vadd.f32 %v279_v21, %v278_v20 }
 0x1b3   : > { %401 = vpush %v280_v22 }
 0x1e4   : > { %s402_s23 = spop %401 }
 0x1e5   : > { %v282_v23 = vstv %s402_s23 }
 0x1e6   : > { %283 = vst [vmem:[%s208_s11] sm:$0xff] %v282_v23 }
 0x1e7   : > { %524 = shalt.err (!%p521_p13)
}
 0x1e8   : > { %405 = dma.vmem_to_hbm [thread:$0]  (%p654_p9), %s299_s18, 128, %s301_s21, %s285_s29  }
 0x1e9 PF: > { %s312_s19 = sand.u32 1, %s559_s12   ;;  %p412_p0 = pnand %p386_p12, %p661_p11 }
 0x1ea   : > { %s313_s6 = scalar_lea.sflag [#allocation4], %s312_s19 }
 0x1eb   : > { %p413_p1 = pneg %p412_p0 }
 0x1ed   : > { %554 = dma.done.wait (%p413_p1), %s313_s6, 128  }
 0x1ee   : > { %556 = vsyncadd (%p413_p1), %s313_s6, 4294967168  ;;  %s19_s17 = sadd.s32 1, %s579_s17   ;;  %s741_s12 = smov %s563_s13 }
 0x1ef   : > { %p16_p2 = scmp.ge.s32.totalorder %s19_s17, 4   ;;  %s742_s13 = smov %s567_s14 }
 0x1f0   : > { %s743_s14 = smov %s659_s26  ;;  %s744_s15 = smov %s575_s16 }
 0x1f1   : > { %s745_s16 = smov %s747_s20  ;;  %18 = sbr.rel (!%p16_p2) target bundleno = 6 (0x6), region = 77 }
 0x1f6   :  { %319 = vsyncpa [#allocation3], 1 }
 0x1f7   :  { %321 = vsyncpa [#allocation3 + $0x1], 1 }
 0x1f8   :  { %322 = vsyncpa [#allocation4], 1 }
 0x1f9   :  { %324 = vsyncpa [#allocation4 + $0x1], 1 }

</bundles_post_ra>
